<compile_context>
chip_gen: v7x
topology: tpu7x:2x2x1
jax: 0.10.0
libtpu: 0.0.40
codegen_flags: <defaults>
</compile_context>

<pallas_src>
import math

import jax
import jax.numpy as jnp
from jax.experimental import pallas as pl
from jax.experimental.pallas import tpu as pltpu


# ----------------------------- kernel ---------------------------------------

def _make_elu_plus_one_kernel(compute_dtype):
    def kernel(x_ref, o_ref):
        x = x_ref[...].astype(compute_dtype)
        one = jnp.asarray(1.0, compute_dtype)
        # NOTE: jnp.where evaluates both branches, so exp(x) overflows to +inf
        # for large positive x in the DISCARDED lane. That is harmless (no NaN
        # propagation through where) -- do not "fix" it with log/reciprocal
        # tricks on that branch.
        o_ref[...] = jnp.where(x > 0, x + one, jnp.exp(x)).astype(o_ref.dtype)
    return kernel


def _phi_jnp(x):
    """Plain JAX phi(x) = elu(x) + 1; XLA fuses this with neighbours."""
    xf = x.astype(jnp.float32)
    return jnp.where(xf > 0, xf + 1.0, jnp.exp(xf)).astype(x.dtype)


# ----------------------------- wrapper ---------------------------------------

_LANE_CANDIDATES = (4096, 2048, 1024, 512, 256, 128)  # lane-dense widths (x128)
_TARGET_BLOCK_BYTES = 8 * 1024 * 1024                 # ~8 MiB block -> 4x = 32 MiB
_VMEM_LIMIT_BYTES = 48 * 1024 * 1024                  # fits v7x 64 MiB, > v5e default
_PALLAS_MIN_BYTES = 1 * 1024 * 1024                   # below this, XLA fusion wins


def _round_up(a, b):
    return ((a + b - 1) // b) * b


def _bf16_compute_ok():
    # v6e / v7x have bf16 VALU + bf16 EUP; v5e (and older) do not.
    try:
        kind = jax.devices()[0].device_kind.lower()
    except Exception:  # pragma: no cover - defensive
        return False
    return ("v6" in kind) or ("v7" in kind)


def activation_feature_map(x, *, row_tile=None, min_pallas_bytes=_PALLAS_MIN_BYTES):
    """phi(x) = elu(x) + 1 element-wise.

    Large, 128-aligned tensors go through a lane-dense Pallas TPU kernel; small
    or oddly-sized tensors return the equivalent jnp expression so XLA can fuse
    it with producers/consumers (strictly faster for a memory-bound elementwise
    op at those sizes).
    """
    orig_shape = x.shape
    total = math.prod(orig_shape) if orig_shape else 1
    if total == 0:
        return x

    itemsize = jnp.dtype(x.dtype).itemsize

    # Small-tensor short circuit: pallas launch + reshape overhead exceeds the
    # work; let XLA fuse the elementwise op instead.
    if total * itemsize < min_pallas_bytes:
        return _phi_jnp(x)

    # Lane-dense flat layout: (rows, C) with C a large multiple of 128 that
    # divides the element count exactly (reshape only -- no padding copy).
    C = None
    for cand in _LANE_CANDIDATES:
        if total % cand == 0:
            C = cand
            break
    if C is None:
        # No 128-multiple factorisation: a Pallas layout would need <128-wide
        # lanes (masked vst regime) or a padding copy. Route to plain jnp.
        return _phi_jnp(x)

    rows = total // C
    x2d = x.reshape(rows, C)

    # Sublane multiple for the dtype: f32 -> 8, bf16 -> 16, int8/fp8 -> 32.
    sub = max(8, 32 // itemsize)

    if row_tile is not None:
        tile = int(row_tile)
        if tile >= rows:
            tile = rows
        else:
            tile = max(sub, (tile // sub) * sub)   # validate (8,128) constraint
            tile = min(tile, rows)
    else:
        tile = _TARGET_BLOCK_BYTES // (C * itemsize)
        tile = max(sub, (tile // sub) * sub)
        if tile >= rows:
            tile = rows
            # Keep >= 2 grid steps when possible so both v7x TCs get work.
            if rows >= 2 * sub:
                tile = _round_up(-(-rows // 2), sub)
        if 0 < tile < rows and rows % tile != 0:
            # Prefer a tile that divides rows so the tail block is full.
            n_blocks = -(-rows // tile)
            even = _round_up(-(-rows // n_blocks), sub)
            if even >= sub and rows % even == 0:
                tile = even

    grid = (pl.cdiv(rows, tile),)   # partial tail block (if any) is masked

    compute_dtype = jnp.float32
    if x.dtype == jnp.bfloat16 and _bf16_compute_ok():
        compute_dtype = jnp.bfloat16

    out2d = pl.pallas_call(
        _make_elu_plus_one_kernel(compute_dtype),
        out_shape=jax.ShapeDtypeStruct((rows, C), x.dtype),
        grid_spec=pltpu.PrefetchScalarGridSpec(
            num_scalar_prefetch=0,
            grid=grid,
            in_specs=[pl.BlockSpec((tile, C), lambda i: (i, 0))],
            out_specs=pl.BlockSpec((tile, C), lambda i: (i, 0)),
        ),
        compiler_params=pltpu.CompilerParams(
            dimension_semantics=("parallel",),
            vmem_limit_bytes=_VMEM_LIMIT_BYTES),
    )(x2d)

    return out2d.reshape(orig_shape)


# ----------------------------- module port -----------------------------------

class FeatureMap:
    """FeatureMap interface (JAX port of the PyTorch base class)."""

    def __init__(self, query_dims):
        self.query_dims = query_dims

    def new_feature_map(self, device=None):
        raise NotImplementedError()

    def forward_queries(self, x):
        return self(x)

    def forward_keys(self, x):
        return self(x)

    def forward(self, x):
        raise NotImplementedError()

    def __call__(self, x):
        return self.forward(x)

    @classmethod
    def factory(cls, *args, **kwargs):
        def inner(query_dims):
            return cls(query_dims, *args, **kwargs)
        return inner


class ActivationFunctionFeatureMap(FeatureMap):
    """Element-wise activation feature map.

    The canonical linear-transformer activation (elu(x)+1) runs through the
    Pallas TPU path above; arbitrary user-supplied callables are applied
    directly in JAX.
    """

    def __init__(self, query_dims, activation_function=None):
        super().__init__(query_dims)
        self.activation_function = activation_function

    def new_feature_map(self, device=None):
        return  # no parameters to (re)sample

    def forward(self, x):
        if self.activation_function is None:
            return activation_feature_map(x)
        # TODO(synk): black-box activation callables are applied directly in
        # JAX; no generic Pallas lowering for an arbitrary Python function.
        return self.activation_function(x)


# Canonical linear-attention feature map: phi(x) = elu(x) + 1.
elu_feature_map = ActivationFunctionFeatureMap.factory()


def _reference(x):
    xf = x.astype(jnp.float32)
    return jnp.where(xf > 0, xf + 1.0, jnp.exp(xf)).astype(x.dtype)


if __name__ == "__main__":
    key = jax.random.PRNGKey(0)
    k0, k1, k2, k3 = jax.random.split(key, 4)

    # (batch, seq, heads, head_dim) -- typical linear-attention query/key shape.
    N, L, H, E = 2, 8, 4, 32
    x = jax.random.normal(k0, (N, L, H, E), dtype=jnp.float32)

    fmap = elu_feature_map(E)
    fmap.new_feature_map()

    # Default path for a small tensor: bypasses pallas (XLA-fusable jnp expr).
    out_bypass = jax.block_until_ready(fmap.forward_queries(x))
    assert out_bypass.shape == x.shape and out_bypass.dtype == x.dtype
    assert jnp.allclose(out_bypass, _reference(x), atol=1e-5, rtol=1e-5)

    # Force the Pallas kernel on the same tensor to exercise the kernel path.
    out_pallas = jax.block_until_ready(
        activation_feature_map(x, min_pallas_bytes=0))
    assert out_pallas.shape == x.shape and out_pallas.dtype == x.dtype
    assert jnp.allclose(out_pallas, _reference(x), atol=1e-5, rtol=1e-5)

    # Multi-block grid with a partial tail block (rows=40, tile=16 -> grid=3).
    x2 = jax.random.normal(k1, (2, 20, 16, 64), dtype=jnp.float32)
    out2 = jax.block_until_ready(
        activation_feature_map(x2, row_tile=16, min_pallas_bytes=0))
    assert jnp.allclose(out2, _reference(x2), atol=1e-5, rtol=1e-5)

    # bf16 I/O path (HBM traffic stays bf16; bf16 compute on v6e/v7x, f32 on v5e).
    x3 = jax.random.normal(k2, (N, L, H, E), dtype=jnp.bfloat16)
    out3 = jax.block_until_ready(
        activation_feature_map(x3, min_pallas_bytes=0))
    assert out3.dtype == jnp.bfloat16
    assert jnp.allclose(out3.astype(jnp.float32),
                        _reference(x3).astype(jnp.float32),
                        atol=2e-2, rtol=2e-2)

    # Odd element count (not a multiple of 128): routes to the jnp expression
    # instead of a sub-128-lane (masked-store) Pallas layout.
    x4 = jax.random.normal(k3, (3, 5, 7), dtype=jnp.float32)
    out4 = jax.block_until_ready(
        activation_feature_map(x4, min_pallas_bytes=0))
    assert jnp.allclose(out4, _reference(x4), atol=1e-5, rtol=1e-5)

    print("KERNEL_OK")
</pallas_src>

<mosaic_0001>
module attributes {stable_mosaic.version = 11 : i64} {
  func.func @kernel(%arg0: i32, %arg1: memref<1x2048xf32, #tpu.memory_space<vmem>>, %arg2: memref<1x2048xf32, #tpu.memory_space<vmem>>) attributes {dimension_semantics = [#tpu.dimension_semantics<parallel>], iteration_bounds = array<i64: 1>, scalar_prefetch = 0 : i64, scratch_operands = 0 : i64, tpu.core_type = #tpu.core_type<tc>, window_params = [{transform_indices = @transform_0, window_bounds = array<i64: 1, 2048>}, {transform_indices = @transform_1, window_bounds = array<i64: 1, 2048>}]} {
    %c0 = arith.constant 0 : index
    %c0_0 = arith.constant 0 : index
    %0 = vector.load %arg1[%c0, %c0_0] : memref<1x2048xf32, #tpu.memory_space<vmem>>, vector<1x2048xf32>
    %cst = arith.constant 0.000000e+00 : f32
    %1 = vector.broadcast %cst : f32 to vector<1x2048xf32>
    %2 = arith.cmpf ogt, %0, %1 : vector<1x2048xf32>
    %cst_1 = arith.constant 1.000000e+00 : f32
    %3 = vector.broadcast %cst_1 : f32 to vector<1x2048xf32>
    %4 = arith.addf %0, %3 : vector<1x2048xf32>
    %5 = math.exp %0 : vector<1x2048xf32>
    %6 = arith.select %2, %4, %5 : vector<1x2048xi1>, vector<1x2048xf32>
    %c0_2 = arith.constant 0 : index
    %c0_3 = arith.constant 0 : index
    %7 = vector.load %arg2[%c0_2, %c0_3] : memref<1x2048xf32, #tpu.memory_space<vmem>>, vector<1x2048xf32>
    tpu.vector_store %arg2[%c0_2, %c0_3], %6 {strides = array<i32>} : memref<1x2048xf32, #tpu.memory_space<vmem>>, vector<1x2048xf32>,
    return
  }
  func.func @transform_0(%arg0: i32) -> (i32, i32) {
    %c0_i32 = arith.constant 0 : i32
    %c0_i32_0 = arith.constant 0 : i32
    return %arg0, %c0_i32 : i32, i32
  }
  func.func @transform_1(%arg0: i32) -> (i32, i32) {
    %c0_i32 = arith.constant 0 : i32
    %c0_i32_0 = arith.constant 0 : i32
    return %arg0, %c0_i32 : i32, i32
  }
}

</mosaic_0001>

<bundles_post_ra>
// kernel: tpu_custom_call.1
= control target key start
LH: loop header
LB: loop body
LE: loop exit
PB: predicated region body
PF: predicated region fallthrough
CT: control target
= control target key end

     0   :  { %6 = vsyncpa [#allocation3], 0  ;;  %s140_s0 = inlined_call_operand.hbm [shape: f32[1,2048], index: 0, kind: input, shape index: {}]   ;;  %s141_s1 = inlined_call_operand.hbm [shape: f32[1,2048], index: 1, kind: output, shape index: {}]  }
   0x1   :  { %7 = vsyncpa [#allocation4], 0  ;;  %s104_s6 = smov [#allocation2]   ;;  %s56_s10 = scalar_lea.hbm %s140_s0, 256 }
   0x2   :  { %s14_s7 = sshll.u32 %s104_s6, 4  ;;  %p57_p0 = scmp.ne.s32.totalorder %s140_s0, %s56_s10  ;;  %s15_s7 = int_to_ptr.vmem [resolvable:$true] %s14_s7 }
   0x3   :  { %p60_p1 = scmp.lt.u32.totalorder %s56_s10, %s140_s0 }
   0x5   :  { %p62_p2 = pnand %p60_p1, %p57_p0 }
   0x7   :  { %65 = shalt.err (!%p62_p2)
}
   0x8   :  { %s66_s15 = scalar_lea.vmem %s15_s7, 256  ;;  %p71_p4 = scmp.lt.s32.totalorder %s15_s7, %s15_s7 }
   0x9   :  { %p67_p3 = scmp.ne.s32.totalorder %s15_s7, %s66_s15  ;;  %p72_p5 = scmp.lt.s32.totalorder %s66_s15, %s66_s15 }
   0xb   :  { %p73_p6 = por %p72_p5, %p71_p4 }
   0xd   :  { %p74_p7 = pnand %p73_p6, %p67_p3 }
   0xf   :  { %77 = shalt.err (!%p74_p7)
}
  0x10   :  { %17 = dma.hbm_to_vmem [thread:$0]  %s140_s0, 256, %s15_s7, [#allocation3]  }
  0x11   :  { %100 = dma.done.wait [#allocation3], 256  }
  0x12   :  { %101 = vsyncadd [#allocation3], 4294967040  ;;  %v21_v0 = vld [vmem:[#allocation2] sm:$0xff]  ;;  %v22_v1 = vld [vmem:[#allocation2 + $0x8] sm:$0xff]  ;;  %s105_s18 = smov [#allocation5]  }
  0x13   :  { %v27_v2 = vmul.f32 1.442695, %v21_v0  ;;  %v29_v3 = vmul.f32 1.442695, %v22_v1  ;;  %v25_v4 = vadd.f32 1.0, %v21_v0  ;;  %vm23_vm0 = vcmp.gt.f32.partialorder %v21_v0, 0.0 }
  0x14   :  { %v26_v5 = vadd.f32 1.0, %v22_v1  ;;  %s41_s19 = sshll.u32 %s105_s18, 4  ;;  %vm24_vm1 = vcmp.gt.f32.partialorder %v22_v1, 0.0  ;;  %s42_s19 = int_to_ptr.vmem [resolvable:$true] %s41_s19 }
  0x15   :  { %52 = vpow2.f32 %v27_v2  ;;  %s78_s0 = scalar_lea.vmem %s42_s19, 256  ;;  %p83_p9 = scmp.lt.s32.totalorder %s42_s19, %s42_s19 }
  0x16   :  { %54 = vpow2.f32 %v29_v3  ;;  %p79_p8 = scmp.ne.s32.totalorder %s42_s19, %s78_s0  ;;  %p84_p10 = scmp.lt.s32.totalorder %s78_s0, %s78_s0 }
  0x18   :  { %p85_p11 = por %p84_p10, %p83_p9 }
  0x1a   :  { %p86_p12 = pnand %p85_p11, %p79_p8 }
  0x1f   :  { %v53_v6 = vpop.eup %52 }
  0x20   :  { %v55_v7 = vpop.eup %54  ;;  %v31_v8 = vsel %vm23_vm0, %v25_v4, %v53_v6 }
  0x21   :  { %33 = vst [vmem:[#allocation5] sm:$0xff] %v31_v8  ;;  %v32_v9 = vsel %vm24_vm1, %v26_v5, %v55_v7 }
  0x22   :  { %34 = vst [vmem:[#allocation5 + $0x8] sm:$0xff] %v32_v9 }
  0x23   :  { %89 = shalt.err (!%p86_p12)
}
  0x24   :  { %s90_s22 = scalar_lea.hbm %s141_s1, 256 }
  0x25   :  { %p91_p13 = scmp.ne.s32.totalorder %s141_s1, %s90_s22  ;;  %p94_p0 = scmp.lt.u32.totalorder %s90_s22, %s141_s1 }
  0x27   :  { %p96_p1 = pnand %p94_p0, %p91_p13 }
  0x29   :  { %99 = shalt.err (!%p96_p1)
}
  0x2a   :  { %44 = dma.vmem_to_hbm [thread:$0]  %s42_s19, 256, %s141_s1, [#allocation4]  }
  0x2b   :  { %102 = dma.done.wait [#allocation4], 256  }
  0x2c   :  { %103 = vsyncadd [#allocation4], 4294967040 }
  0x2d   :  { %48 = vsyncpa [#allocation3], 1 }
  0x2e   :  { %49 = vsyncpa [#allocation4], 1 }

</bundles_post_ra>
